<compile_context>
chip_gen: v7x
topology: tpu7x:2x2x1
jax: 0.10.0
libtpu: 0.0.40
codegen_flags: <defaults>
</compile_context>

<pallas_src>
import functools

import jax
import jax.numpy as jnp
from jax.experimental import pallas as pl
from jax.experimental.pallas import tpu as pltpu

LANE = 128
_DEF_VMEM_FALLBACK = 64 * 1024 * 1024  # conservative: v7x per-core VMEM


def _round_up(x, m):
    return ((x + m - 1) // m) * m


@functools.lru_cache(maxsize=1)
def _vmem_limit_bytes():
    """Generation-aware scoped-VMEM budget (v5e/v6e: 128 MiB, v7x: 64 MiB)."""
    cap = 0
    try:
        info = pltpu.get_tpu_info()
        cap = int(getattr(info, "vmem_capacity_bytes", 0) or 0)
    except Exception:
        cap = 0
    if cap <= 0:
        cap = _DEF_VMEM_FALLBACK
    # Request ~3/4 of physical (double-buffered blocks count twice), capped.
    return max(32 * 1024 * 1024, min((cap * 3) // 4, 96 * 1024 * 1024))


def _largest_divisor(n, candidates):
    for c in candidates:
        if n % c == 0:
            return c
    return n


def _choose_tiling(n):
    """Return (n_pad, tm, tk, tm_xw) for the node dimension.

    Small graphs: whole-K tiles and exactly 2 row tiles (keeps both v7x
    TensorCores busy on the "parallel" row axis). Large graphs: tight
    multiple-of-256 padding with 512-1024 x 1024-2048 tiles that divide it.
    """
    if n <= 1024:
        n_pad = _round_up(n, 32)       # tm = n_pad // 2 stays 16-aligned
        tm = n_pad // 2
        tk = n_pad
        return n_pad, tm, tk, tm
    n_pad = _round_up(n, 256)          # A_hat traffic scales as n_pad^2
    tm = _largest_divisor(n_pad, (1024, 512, 256))
    tk = _largest_divisor(n_pad, (2048, 1024, 512, 256))
    tm_xw = _largest_divisor(n_pad, (2048, 1024, 512, 256))
    return n_pad, tm, tk, tm_xw


# ----------------------------------------------------------------------------
# Kernel 1: XW = X @ W   (row-tiled, bf16 in, bf16 out, f32 accumulate)
# ----------------------------------------------------------------------------
def _xw_kernel(x_ref, w_ref, o_ref):
    o_ref[...] = jnp.dot(
        x_ref[...], w_ref[...], preferred_element_type=jnp.float32
    ).astype(o_ref.dtype)


def _matmul_xw(x_bf16, w_bf16, tm):
    n_pad, c_in_pad = x_bf16.shape
    c_out_pad = w_bf16.shape[1]
    flops = 2 * n_pad * c_in_pad * c_out_pad
    bytes_accessed = 2 * (x_bf16.size + w_bf16.size + n_pad * c_out_pad)
    return pl.pallas_call(
        _xw_kernel,
        out_shape=jax.ShapeDtypeStruct((n_pad, c_out_pad), jnp.bfloat16),
        grid=(n_pad // tm,),
        in_specs=[
            pl.BlockSpec((tm, c_in_pad), lambda i: (i, 0)),
            pl.BlockSpec((c_in_pad, c_out_pad), lambda i: (0, 0)),
        ],
        out_specs=pl.BlockSpec((tm, c_out_pad), lambda i: (i, 0)),
        compiler_params=pltpu.CompilerParams(
            dimension_semantics=("parallel",),
            vmem_limit_bytes=_vmem_limit_bytes(),
        ),
        cost_estimate=pl.CostEstimate(
            flops=flops, transcendentals=0, bytes_accessed=bytes_accessed
        ),
    )(x_bf16, w_bf16)


# ----------------------------------------------------------------------------
# Kernel 2: out = [relu]( A_hat @ XW + b )   (tiled, accumulated in VMEM f32)
# ----------------------------------------------------------------------------
def _agg_kernel(a_ref, xw_ref, b_ref, o_ref, acc_ref, *,
                apply_relu: bool, xw_resident: bool, tk: int):
    k = pl.program_id(1)

    @pl.when(k == 0)
    def _():
        acc_ref[...] = jnp.zeros_like(acc_ref)

    if xw_resident:
        # XW lives fully in VMEM (single DMA); slice the k-th chunk in-kernel.
        off = pl.multiple_of(k * tk, tk)
        xw_blk = xw_ref[pl.ds(off, tk), :]
    else:
        xw_blk = xw_ref[...]

    acc_ref[...] += jnp.dot(a_ref[...], xw_blk, preferred_element_type=jnp.float32)

    @pl.when(k == pl.num_programs(1) - 1)
    def _():
        out = acc_ref[...] + b_ref[...]
        if apply_relu:
            out = jnp.maximum(out, 0.0)
        o_ref[...] = out.astype(o_ref.dtype)


def _aggregate(a_hat_bf16, xw_bf16, b_f32, *, apply_relu, out_dtype, tm, tk,
               vmem_limit):
    n_pad = a_hat_bf16.shape[0]
    c_pad = xw_bf16.shape[1]
    n_row_tiles = n_pad // tm
    n_k_tiles = n_pad // tk

    # Keep XW VMEM-resident (one DMA, constant index_map) when it fits a slice
    # of the budget; otherwise stream (tk, c_pad) chunks (re-read per row tile).
    xw_bytes = n_pad * c_pad * 2  # bf16
    xw_resident = 2 * xw_bytes <= vmem_limit // 4

    if xw_resident:
        xw_spec = pl.BlockSpec((n_pad, c_pad), lambda i, k: (0, 0))
        xw_traffic = xw_bytes
    else:
        xw_spec = pl.BlockSpec((tk, c_pad), lambda i, k: (k, 0))
        xw_traffic = xw_bytes * n_row_tiles

    kernel = functools.partial(
        _agg_kernel, apply_relu=apply_relu, xw_resident=xw_resident, tk=tk
    )
    out_itemsize = jnp.dtype(out_dtype).itemsize
    flops = 2 * n_pad * n_pad * c_pad
    bytes_accessed = (
        2 * a_hat_bf16.size + xw_traffic + 4 * b_f32.size
        + out_itemsize * n_pad * c_pad
    )
    return pl.pallas_call(
        kernel,
        out_shape=jax.ShapeDtypeStruct((n_pad, c_pad), out_dtype),
        grid=(n_row_tiles, n_k_tiles),
        in_specs=[
            pl.BlockSpec((tm, tk), lambda i, k: (i, k)),
            xw_spec,
            pl.BlockSpec((1, c_pad), lambda i, k: (0, 0)),
        ],
        out_specs=pl.BlockSpec((tm, c_pad), lambda i, k: (i, 0)),
        scratch_shapes=[pltpu.VMEM((tm, c_pad), jnp.float32)],
        compiler_params=pltpu.CompilerParams(
            dimension_semantics=("parallel", "arbitrary"),
            vmem_limit_bytes=vmem_limit,
        ),
        cost_estimate=pl.CostEstimate(
            flops=flops, transcendentals=0, bytes_accessed=bytes_accessed
        ),
    )(a_hat_bf16, xw_bf16, b_f32)


# ----------------------------------------------------------------------------
# One GCNConv layer (operates on padded, bf16 node features)
# ----------------------------------------------------------------------------
def gcn_layer(a_hat_bf16, x_bf16, w, b, *, apply_relu, out_dtype, tm, tk,
              tm_xw, vmem_limit):
    """a_hat_bf16: (N_pad, N_pad) bf16; x_bf16: (N_pad, Cin_pad) bf16;
    w: (Cin, Cout) f32 (== PyTorch lin.weight.T); b: (Cout,) f32.
    Returns padded output (N_pad, Cout_pad) in `out_dtype`."""
    c_in, c_out = w.shape
    c_in_pad = x_bf16.shape[1]
    c_out_pad = _round_up(c_out, LANE)

    # Zero-pad weights / bias to lane-dense widths (padded cols stay zero).
    w_pad = (
        jnp.zeros((c_in_pad, c_out_pad), jnp.float32)
        .at[:c_in, :c_out]
        .set(w)
        .astype(jnp.bfloat16)
    )
    b_pad = jnp.zeros((1, c_out_pad), jnp.float32).at[0, :c_out].set(b)

    xw = _matmul_xw(x_bf16, w_pad, tm_xw)  # (N_pad, Cout_pad) bf16, once
    return _aggregate(a_hat_bf16, xw, b_pad, apply_relu=apply_relu,
                      out_dtype=out_dtype, tm=tm, tk=tk, vmem_limit=vmem_limit)


# ----------------------------------------------------------------------------
# Glue: symmetrically-normalized adjacency with self-loops (PyG GCNConv
# defaults), built directly into a single padded buffer and cast to bf16 once.
# Duplicate edges accumulate (scatter-add), matching PyG.
# ----------------------------------------------------------------------------
def normalized_adjacency_padded(edge_index, num_nodes, n_pad):
    src, dst = edge_index[0], edge_index[1]
    ones = jnp.ones(src.shape, jnp.float32)
    # deg over targets (+1 for the self loop), duplicates counted.
    deg = jnp.ones((num_nodes,), jnp.float32).at[dst].add(ones)
    d_inv_sqrt = jax.lax.rsqrt(deg)
    a = jnp.zeros((n_pad, n_pad), jnp.float32)
    # message flows src -> dst, weight = d^-1/2[dst] * d^-1/2[src]
    a = a.at[dst, src].add(d_inv_sqrt[dst] * d_inv_sqrt[src])
    diag = jnp.arange(num_nodes)
    a = a.at[diag, diag].add(d_inv_sqrt * d_inv_sqrt)
    return a.astype(jnp.bfloat16)


# ----------------------------------------------------------------------------
# GCNEncoder forward
# ----------------------------------------------------------------------------
def gcn_encoder_forward(params, x, edge_index):
    n, c_in = x.shape
    c_out = params["w2"].shape[1]
    n_pad, tm, tk, tm_xw = _choose_tiling(n)
    c_in_pad = _round_up(c_in, LANE)
    vmem_limit = _vmem_limit_bytes()

    # Build A_hat once, padded, bf16 (shared by both layers).
    a_hat_pad = normalized_adjacency_padded(edge_index, n, n_pad)

    x_pad = (
        jnp.zeros((n_pad, c_in_pad), jnp.float32).at[:n, :c_in].set(x)
    ).astype(jnp.bfloat16)

    # conv1 + relu: emit bf16 directly from the kernel epilogue (fed to conv2).
    h = gcn_layer(a_hat_pad, x_pad, params["w1"], params["b1"],
                  apply_relu=True, out_dtype=jnp.bfloat16,
                  tm=tm, tk=tk, tm_xw=tm_xw, vmem_limit=vmem_limit)
    # conv2 (no activation), f32 output.
    out_pad = gcn_layer(a_hat_pad, h, params["w2"], params["b2"],
                        apply_relu=False, out_dtype=jnp.float32,
                        tm=tm, tk=tk, tm_xw=tm_xw, vmem_limit=vmem_limit)
    return out_pad[:n, :c_out]


def init_params(key, in_channels, out_channels):
    hidden = 2 * out_channels
    k1, k2 = jax.random.split(key)

    def glorot(k, fan_in, fan_out):
        limit = jnp.sqrt(6.0 / (fan_in + fan_out))
        return jax.random.uniform(
            k, (fan_in, fan_out), jnp.float32, minval=-limit, maxval=limit
        )

    return {
        "w1": glorot(k1, in_channels, hidden),
        "b1": jnp.zeros((hidden,), jnp.float32),
        "w2": glorot(k2, hidden, out_channels),
        "b2": jnp.zeros((out_channels,), jnp.float32),
    }


if __name__ == "__main__":
    key = jax.random.PRNGKey(0)
    kx, kp = jax.random.split(key)

    num_nodes = 16
    in_channels = 8
    out_channels = 4  # hidden = 8

    # Deterministic node features
    x = jax.random.normal(kx, (num_nodes, in_channels), dtype=jnp.float32)

    # Deterministic small graph: a bidirectional ring, shape (2, E)
    src = jnp.arange(num_nodes, dtype=jnp.int32)
    dst = (src + 1) % num_nodes
    edge_index = jnp.concatenate(
        [jnp.stack([src, dst]), jnp.stack([dst, src])], axis=1
    )

    params = init_params(kp, in_channels, out_channels)

    out = jax.jit(gcn_encoder_forward)(params, x, edge_index)
    jax.block_until_ready(out)

    # Pure-JAX f32 reference (bf16 matmuls in the kernel -> relaxed tolerance).
    def ref_normalized_adjacency(ei, n):
        s, d = ei[0], ei[1]
        adj = jnp.zeros((n, n), jnp.float32).at[d, s].add(1.0)
        adj = adj + jnp.eye(n, dtype=jnp.float32)
        deg = jnp.sum(adj, axis=1)
        dis = jnp.where(deg > 0, 1.0 / jnp.sqrt(deg), 0.0)
        return dis[:, None] * adj * dis[None, :]

    a_hat_ref = ref_normalized_adjacency(edge_index, num_nodes)
    h_ref = jnp.maximum(a_hat_ref @ (x @ params["w1"]) + params["b1"], 0.0)
    ref = a_hat_ref @ (h_ref @ params["w2"]) + params["b2"]

    assert out.shape == (num_nodes, out_channels)
    assert out.dtype == jnp.float32
    assert jnp.allclose(out, ref, atol=5e-2, rtol=5e-2)
    print("KERNEL_OK")
</pallas_src>

<mosaic_0001>
module attributes {stable_mosaic.version = 11 : i64} {
  func.func private @main(%arg0: i32) attributes {dimension_semantics = [#tpu.dimension_semantics<core_parallel>], iteration_bounds = array<i64: 2>, tpu.core_type = #tpu.core_type<sc_scalar_subcore>, window_params = []} {
    return
  }
}

module attributes {stable_mosaic.version = 11 : i64} {
  func.func private @main(%arg0: i32) attributes {dimension_semantics = [#tpu.dimension_semantics<core_parallel>], iteration_bounds = array<i64: 2>, tpu.core_type = #tpu.core_type<sc_scalar_subcore>, window_params = []} {
    return
  }
}

module attributes {stable_mosaic.version = 11 : i64} {
  func.func @_xw_kernel(%arg0: i32, %arg1: memref<16x128xbf16, #tpu.memory_space<vmem>>, %arg2: memref<128x128xbf16, #tpu.memory_space<vmem>>, %arg3: memref<16x128xbf16, #tpu.memory_space<vmem>>) attributes {dimension_semantics = [#tpu.dimension_semantics<parallel>], iteration_bounds = array<i64: 2>, scalar_prefetch = 0 : i64, scratch_operands = 0 : i64, tpu.core_type = #tpu.core_type<tc>, window_params = [{transform_indices = @transform_0, window_bounds = array<i64: 16, 128>}, {pipeline_mode = #tpu.pipeline_mode<synchronous>, transform_indices = @transform_1, window_bounds = array<i64: 128, 128>}, {transform_indices = @transform_2, window_bounds = array<i64: 16, 128>}]} {
    %c0 = arith.constant 0 : index
    %c0_0 = arith.constant 0 : index
    %0 = vector.load %arg1[%c0, %c0_0] : memref<16x128xbf16, #tpu.memory_space<vmem>>, vector<16x128xbf16>
    %c0_1 = arith.constant 0 : index
    %c0_2 = arith.constant 0 : index
    %1 = vector.load %arg2[%c0_1, %c0_2] : memref<128x128xbf16, #tpu.memory_space<vmem>>, vector<128x128xbf16>
    %cst = arith.constant dense<0.000000e+00> : vector<16x128xf32>
    %2 = tpu.matmul %0, %1, %cst {dimension_numbers = #tpu.dot_dimension_numbers<[1], [0], [0], [1], [0, 0, 1, 1], [], []>} : vector<16x128xbf16>, vector<128x128xbf16>, vector<16x128xf32> -> vector<16x128xf32>
    %3 = arith.truncf %2 : vector<16x128xf32> to vector<16x128xbf16>
    %c0_3 = arith.constant 0 : index
    %c0_4 = arith.constant 0 : index
    %4 = vector.load %arg3[%c0_3, %c0_4] : memref<16x128xbf16, #tpu.memory_space<vmem>>, vector<16x128xbf16>
    tpu.vector_store %arg3[%c0_3, %c0_4], %3 {strides = array<i32>} : memref<16x128xbf16, #tpu.memory_space<vmem>>, vector<16x128xbf16>,
    return
  }
  func.func @transform_0(%arg0: i32) -> (i32, i32) {
    %c0_i32 = arith.constant 0 : i32
    %c0_i32_0 = arith.constant 0 : i32
    return %arg0, %c0_i32 : i32, i32
  }
  func.func @transform_1(%arg0: i32) -> (i32, i32) {
    %c0_i32 = arith.constant 0 : i32
    %c0_i32_0 = arith.constant 0 : i32
    %c0_i32_1 = arith.constant 0 : i32
    return %c0_i32, %c0_i32_0 : i32, i32
  }
  func.func @transform_2(%arg0: i32) -> (i32, i32) {
    %c0_i32 = arith.constant 0 : i32
    %c0_i32_0 = arith.constant 0 : i32
    return %arg0, %c0_i32 : i32, i32
  }
}

module attributes {stable_mosaic.version = 11 : i64} {
  func.func @_agg_kernel(%arg0: i32, %arg1: i32, %arg2: memref<16x32xbf16, #tpu.memory_space<vmem>>, %arg3: memref<32x128xbf16, #tpu.memory_space<vmem>>, %arg4: memref<1x128xf32, #tpu.memory_space<vmem>>, %arg5: memref<16x128xbf16, #tpu.memory_space<vmem>>, %arg6: memref<16x128xf32, #tpu.memory_space<vmem>>) attributes {dimension_semantics = [#tpu.dimension_semantics<parallel>, #tpu.dimension_semantics<arbitrary>], iteration_bounds = array<i64: 2, 1>, scalar_prefetch = 0 : i64, scratch_operands = 1 : i64, tpu.core_type = #tpu.core_type<tc>, window_params = [{transform_indices = @transform_0, window_bounds = array<i64: 16, 32>}, {pipeline_mode = #tpu.pipeline_mode<synchronous>, transform_indices = @transform_1, window_bounds = array<i64: 32, 128>}, {pipeline_mode = #tpu.pipeline_mode<synchronous>, transform_indices = @transform_2, window_bounds = array<i64: 1, 128>}, {transform_indices = @transform_3, window_bounds = array<i64: 16, 128>}]} {
    %c0_i32 = arith.constant 0 : i32
    %0 = arith.cmpi eq, %arg1, %c0_i32 : i32
    %1 = arith.extui %0 : i1 to i32
    %c0_i32_0 = arith.constant 0 : i32
    %2 = arith.cmpi ne, %1, %c0_i32_0 : i32
    scf.if %2 {
      %cst_9 = arith.constant 0.000000e+00 : f32
      %15 = vector.broadcast %cst_9 : f32 to vector<16x128xf32>
      %c0_10 = arith.constant 0 : index
      %c0_11 = arith.constant 0 : index
      %16 = vector.load %arg6[%c0_10, %c0_11] : memref<16x128xf32, #tpu.memory_space<vmem>>, vector<16x128xf32>
      tpu.vector_store %arg6[%c0_10, %c0_11], %15 {strides = array<i32>} : memref<16x128xf32, #tpu.memory_space<vmem>>, vector<16x128xf32>,
    } else {
    }
    %c32_i32 = arith.constant 32 : i32
    %3 = arith.muli %arg1, %c32_i32 : i32
    %4 = tpu.assume_multiple %3, 32 : i32
    %5 = arith.index_cast %4 : i32 to index
    %c0 = arith.constant 0 : index
    %6 = vector.load %arg3[%5, %c0] : memref<32x128xbf16, #tpu.memory_space<vmem>>, vector<32x128xbf16>
    %c0_1 = arith.constant 0 : index
    %c0_2 = arith.constant 0 : index
    %7 = vector.load %arg6[%c0_1, %c0_2] : memref<16x128xf32, #tpu.memory_space<vmem>>, vector<16x128xf32>
    %c0_3 = arith.constant 0 : index
    %c0_4 = arith.constant 0 : index
    %8 = vector.load %arg2[%c0_3, %c0_4] : memref<16x32xbf16, #tpu.memory_space<vmem>>, vector<16x32xbf16>
    %cst = arith.constant dense<0.000000e+00> : vector<16x128xf32>
    %9 = tpu.matmul %8, %6, %cst {dimension_numbers = #tpu.dot_dimension_numbers<[1], [0], [0], [1], [0, 0, 1, 1], [], []>} : vector<16x32xbf16>, vector<32x128xbf16>, vector<16x128xf32> -> vector<16x128xf32>
    %10 = arith.addf %7, %9 : vector<16x128xf32>
    %c0_5 = arith.constant 0 : index
    %c0_6 = arith.constant 0 : index
    %11 = vector.load %arg6[%c0_5, %c0_6] : memref<16x128xf32, #tpu.memory_space<vmem>>, vector<16x128xf32>
    tpu.vector_store %arg6[%c0_5, %c0_6], %10 {strides = array<i32>} : memref<16x128xf32, #tpu.memory_space<vmem>>, vector<16x128xf32>,
    %c0_i32_7 = arith.constant 0 : i32
    %12 = arith.cmpi eq, %arg1, %c0_i32_7 : i32
    %13 = arith.extui %12 : i1 to i32
    %c0_i32_8 = arith.constant 0 : i32
    %14 = arith.cmpi ne, %13, %c0_i32_8 : i32
    scf.if %14 {
      %c0_9 = arith.constant 0 : index
      %c0_10 = arith.constant 0 : index
      %15 = vector.load %arg6[%c0_9, %c0_10] : memref<16x128xf32, #tpu.memory_space<vmem>>, vector<16x128xf32>
      %c0_11 = arith.constant 0 : index
      %c0_12 = arith.constant 0 : index
      %16 = vector.load %arg4[%c0_11, %c0_12] : memref<1x128xf32, #tpu.memory_space<vmem>>, vector<1x128xf32>
      %17 = vector.broadcast %16 : vector<1x128xf32> to vector<16x128xf32>
      %18 = arith.addf %15, %17 : vector<16x128xf32>
      %cst_13 = arith.constant 0.000000e+00 : f32
      %19 = vector.broadcast %cst_13 : f32 to vector<16x128xf32>
      %20 = arith.maximumf %18, %19 : vector<16x128xf32>
      %21 = arith.truncf %20 : vector<16x128xf32> to vector<16x128xbf16>
      %c0_14 = arith.constant 0 : index
      %c0_15 = arith.constant 0 : index
      %22 = vector.load %arg5[%c0_14, %c0_15] : memref<16x128xbf16, #tpu.memory_space<vmem>>, vector<16x128xbf16>
      tpu.vector_store %arg5[%c0_14, %c0_15], %21 {strides = array<i32>} : memref<16x128xbf16, #tpu.memory_space<vmem>>, vector<16x128xbf16>,
    } else {
    }
    return
  }
  func.func @transform_0(%arg0: i32, %arg1: i32) -> (i32, i32) {
    %c0_i32 = arith.constant 0 : i32
    return %arg0, %arg1 : i32, i32
  }
  func.func @transform_1(%arg0: i32, %arg1: i32) -> (i32, i32) {
    %c0_i32 = arith.constant 0 : i32
    %c0_i32_0 = arith.constant 0 : i32
    %c0_i32_1 = arith.constant 0 : i32
    return %c0_i32, %c0_i32_0 : i32, i32
  }
  func.func @transform_2(%arg0: i32, %arg1: i32) -> (i32, i32) {
    %c0_i32 = arith.constant 0 : i32
    %c0_i32_0 = arith.constant 0 : i32
    %c0_i32_1 = arith.constant 0 : i32
    return %c0_i32, %c0_i32_0 : i32, i32
  }
  func.func @transform_3(%arg0: i32, %arg1: i32) -> (i32, i32) {
    %c0_i32 = arith.constant 0 : i32
    %c0_i32_0 = arith.constant 0 : i32
    return %arg0, %c0_i32 : i32, i32
  }
}

module attributes {stable_mosaic.version = 11 : i64} {
  func.func @_agg_kernel(%arg0: i32, %arg1: i32, %arg2: memref<16x32xbf16, #tpu.memory_space<vmem>>, %arg3: memref<32x128xbf16, #tpu.memory_space<vmem>>, %arg4: memref<1x128xf32, #tpu.memory_space<vmem>>, %arg5: memref<16x128xf32, #tpu.memory_space<vmem>>, %arg6: memref<16x128xf32, #tpu.memory_space<vmem>>) attributes {dimension_semantics = [#tpu.dimension_semantics<parallel>, #tpu.dimension_semantics<arbitrary>], iteration_bounds = array<i64: 2, 1>, scalar_prefetch = 0 : i64, scratch_operands = 1 : i64, tpu.core_type = #tpu.core_type<tc>, window_params = [{transform_indices = @transform_0, window_bounds = array<i64: 16, 32>}, {pipeline_mode = #tpu.pipeline_mode<synchronous>, transform_indices = @transform_1, window_bounds = array<i64: 32, 128>}, {pipeline_mode = #tpu.pipeline_mode<synchronous>, transform_indices = @transform_2, window_bounds = array<i64: 1, 128>}, {transform_indices = @transform_3, window_bounds = array<i64: 16, 128>}]} {
    %c0_i32 = arith.constant 0 : i32
    %0 = arith.cmpi eq, %arg1, %c0_i32 : i32
    %1 = arith.extui %0 : i1 to i32
    %c0_i32_0 = arith.constant 0 : i32
    %2 = arith.cmpi ne, %1, %c0_i32_0 : i32
    scf.if %2 {
      %cst_9 = arith.constant 0.000000e+00 : f32
      %15 = vector.broadcast %cst_9 : f32 to vector<16x128xf32>
      %c0_10 = arith.constant 0 : index
      %c0_11 = arith.constant 0 : index
      %16 = vector.load %arg6[%c0_10, %c0_11] : memref<16x128xf32, #tpu.memory_space<vmem>>, vector<16x128xf32>
      tpu.vector_store %arg6[%c0_10, %c0_11], %15 {strides = array<i32>} : memref<16x128xf32, #tpu.memory_space<vmem>>, vector<16x128xf32>,
    } else {
    }
    %c32_i32 = arith.constant 32 : i32
    %3 = arith.muli %arg1, %c32_i32 : i32
    %4 = tpu.assume_multiple %3, 32 : i32
    %5 = arith.index_cast %4 : i32 to index
    %c0 = arith.constant 0 : index
    %6 = vector.load %arg3[%5, %c0] : memref<32x128xbf16, #tpu.memory_space<vmem>>, vector<32x128xbf16>
    %c0_1 = arith.constant 0 : index
    %c0_2 = arith.constant 0 : index
    %7 = vector.load %arg6[%c0_1, %c0_2] : memref<16x128xf32, #tpu.memory_space<vmem>>, vector<16x128xf32>
    %c0_3 = arith.constant 0 : index
    %c0_4 = arith.constant 0 : index
    %8 = vector.load %arg2[%c0_3, %c0_4] : memref<16x32xbf16, #tpu.memory_space<vmem>>, vector<16x32xbf16>
    %cst = arith.constant dense<0.000000e+00> : vector<16x128xf32>
    %9 = tpu.matmul %8, %6, %cst {dimension_numbers = #tpu.dot_dimension_numbers<[1], [0], [0], [1], [0, 0, 1, 1], [], []>} : vector<16x32xbf16>, vector<32x128xbf16>, vector<16x128xf32> -> vector<16x128xf32>
    %10 = arith.addf %7, %9 : vector<16x128xf32>
    %c0_5 = arith.constant 0 : index
    %c0_6 = arith.constant 0 : index
    %11 = vector.load %arg6[%c0_5, %c0_6] : memref<16x128xf32, #tpu.memory_space<vmem>>, vector<16x128xf32>
    tpu.vector_store %arg6[%c0_5, %c0_6], %10 {strides = array<i32>} : memref<16x128xf32, #tpu.memory_space<vmem>>, vector<16x128xf32>,
    %c0_i32_7 = arith.constant 0 : i32
    %12 = arith.cmpi eq, %arg1, %c0_i32_7 : i32
    %13 = arith.extui %12 : i1 to i32
    %c0_i32_8 = arith.constant 0 : i32
    %14 = arith.cmpi ne, %13, %c0_i32_8 : i32
    scf.if %14 {
      %c0_9 = arith.constant 0 : index
      %c0_10 = arith.constant 0 : index
      %15 = vector.load %arg6[%c0_9, %c0_10] : memref<16x128xf32, #tpu.memory_space<vmem>>, vector<16x128xf32>
      %c0_11 = arith.constant 0 : index
      %c0_12 = arith.constant 0 : index
      %16 = vector.load %arg4[%c0_11, %c0_12] : memref<1x128xf32, #tpu.memory_space<vmem>>, vector<1x128xf32>
      %17 = vector.broadcast %16 : vector<1x128xf32> to vector<16x128xf32>
      %18 = arith.addf %15, %17 : vector<16x128xf32>
      %c0_13 = arith.constant 0 : index
      %c0_14 = arith.constant 0 : index
      %19 = vector.load %arg5[%c0_13, %c0_14] : memref<16x128xf32, #tpu.memory_space<vmem>>, vector<16x128xf32>
      tpu.vector_store %arg5[%c0_13, %c0_14], %18 {strides = array<i32>} : memref<16x128xf32, #tpu.memory_space<vmem>>, vector<16x128xf32>,
    } else {
    }
    return
  }
  func.func @transform_0(%arg0: i32, %arg1: i32) -> (i32, i32) {
    %c0_i32 = arith.constant 0 : i32
    return %arg0, %arg1 : i32, i32
  }
  func.func @transform_1(%arg0: i32, %arg1: i32) -> (i32, i32) {
    %c0_i32 = arith.constant 0 : i32
    %c0_i32_0 = arith.constant 0 : i32
    %c0_i32_1 = arith.constant 0 : i32
    return %c0_i32, %c0_i32_0 : i32, i32
  }
  func.func @transform_2(%arg0: i32, %arg1: i32) -> (i32, i32) {
    %c0_i32 = arith.constant 0 : i32
    %c0_i32_0 = arith.constant 0 : i32
    %c0_i32_1 = arith.constant 0 : i32
    return %c0_i32, %c0_i32_0 : i32, i32
  }
  func.func @transform_3(%arg0: i32, %arg1: i32) -> (i32, i32) {
    %c0_i32 = arith.constant 0 : i32
    %c0_i32_0 = arith.constant 0 : i32
    return %arg0, %c0_i32 : i32, i32
  }
}

</mosaic_0001>

<bundles_post_ra>
// kernel: mul.2
= control target key start
LH: loop header
LB: loop body
LE: loop exit
PB: predicated region body
PF: predicated region fallthrough
CT: control target
= control target key end

     0   :  { %s34_s0 = inlined_call_operand.vmem [shape: f32[32], index: 0, kind: input, shape index: {}]   ;;  %s35_s1 = inlined_call_operand.vmem [shape: f32[32], index: 1, kind: input, shape index: {}]   ;;  %s36_s2 = inlined_call_operand.vmem [shape: f32[32], index: 2, kind: output, shape index: {}]  }
   0x1   :  { %v3_v0 = vld [vmem:[%s34_s0] sm:$0x1] }
   0x2   :  { %v4_v1 = vld [vmem:[%s35_s1] sm:$0x1] }
   0x3   :  { %v7_v2 = vmul.f32 %v4_v1, %v3_v0 }
   0x5   :  { %9 = vst [vmem:[%s36_s2] sm:$0x1] %v7_v2 }

// kernel: gcn_encoder_forward.4
= control target key start
LH: loop header
LB: loop body
LE: loop exit
PB: predicated region body
PF: predicated region fallthrough
CT: control target
= control target key end

     0   :  { %s429_s9 = smov 0   ;;  %s470_s0 = inlined_call_operand.vmem [shape: bf16[32,128], index: 0, kind: input, shape index: {}]   ;;  %s471_s1 = inlined_call_operand.vmem [shape: bf16[128,128], index: 1, kind: input, shape index: {}]   ;;  %s472_s2 = inlined_call_operand.vmem [shape: bf16[32,128], index: 2, kind: output, shape index: {}]  }
   0x1 LB: > { %s327_s10 = sadd.s32 4294967295, %s410_s9   ;;  %p331_p0 = scmp.ge.s32.totalorder %s410_s9, 1  ;;  %s410_s9 = sphi %s429_s9, %s12_s9  }
   0x2   : > { %p113_p1 = scmp.lt.s32.totalorder %s410_s9, 3 }
   0x4   : > { %p114_p2 = pnand %p331_p0, %p113_p1 }
   0x5   : > { %v395_v0 = vld [vmem:[%s471_s1] sm:$0xff] (!%p114_p2)   ;;  %v412_v1 = vmov (!%p114_p2), 0.0   ;;  %v396_v2 = vld [vmem:[%s471_s1 + $0x8] sm:$0xff] (!%p114_p2)   ;;  %vm413_vm0 = vmmov (!%p114_p2), 0   ;;  %s332_s15 = sshll.u32 (!%p114_p2), %s327_s10, 1  ;;  %v397_v3 = vld [vmem:[%s471_s1 + $0x10] sm:$0xff] (!%p114_p2)  }
   0x6   : > { %117 = sbr.rel (%p114_p2) target bundleno = 255 (0xff), region = 28  ;;  %365 = vmatprep.subr.bf16.mxu0 (!%p114_p2), %v412_v1  ;;  %381 = vmatprep.mubr.msk.bf16.mxu0 (!%p114_p2), %vm413_vm0, %v412_v1  ;;  %p136_p3 = scmp.lt.s32.totalorder (!%p114_p2), %s332_s15, 3  ;;  %v398_v4 = vld [vmem:[%s471_s1 + $0x18] sm:$0xff] (!%p114_p2)   ;;  %v399_v5 = vld [vmem:[%s471_s1 + $0x20] sm:$0xff] (!%p114_p2)   ;;  %v400_v6 = vld [vmem:[%s471_s1 + $0x28] sm:$0xff] (!%p114_p2)  }
   0x7   : > { %366 = vmatpush3.bf16.msra.mxu0 (!%p114_p2), %v395_v0  ;;  %v401_v7 = vld [vmem:[%s471_s1 + $0x30] sm:$0xff] (!%p114_p2)   ;;  %v402_v8 = vld [vmem:[%s471_s1 + $0x38] sm:$0xff] (!%p114_p2)  }
   0x8   : > { %367 = vmatprep.subr.bf16.mxu0 (!%p114_p2), %v412_v1 }
   0xb   : > { %368 = vmatpush3.bf16.msra.mxu0 (!%p114_p2), %v396_v2 }
   0xc   : > { %369 = vmatprep.subr.bf16.mxu0 (!%p114_p2), %v412_v1 }
   0xd   : > { %s474_s15 = smov (!%p136_p3, %s332_s15), 3 }
   0xe   : > { %s333_s18 = sshll.u32 %s474_s15, 2 }
   0xf   : > { %s139_s21 = scalar_lea.vmem %s470_s0, %s333_s18  ;;  %370 = vmatpush3.bf16.msra.mxu0 %v397_v3  ;;  %s145_s6 = scalar_lea.vmem %s472_s2, %s333_s18 }
  0x10   : > { %371 = vmatprep.subr.bf16.mxu0 %v412_v1  ;;  %v403_v9 = vld [vmem:[%s139_s21] sm:$0xff]  }
  0x13   : > { %372 = vmatpush3.bf16.msra.mxu0 %v398_v4 }
  0x14   : > { %373 = vmatprep.subr.bf16.mxu0 %v412_v1 }
  0x17   : > { %374 = vmatpush3.bf16.msra.mxu0 %v399_v5 }
  0x18   : > { %375 = vmatprep.subr.bf16.mxu0 %v412_v1 }
  0x1b   : > { %376 = vmatpush3.bf16.msra.mxu0 %v400_v6 }
  0x1c   : > { %377 = vmatprep.subr.bf16.mxu0 %v412_v1 }
  0x1f   : > { %378 = vmatpush3.bf16.msra.mxu0 %v401_v7 }
  0x20   : > { %379 = vmatprep.subr.bf16.mxu0 %v412_v1 }
  0x23   : > { %380 = vmatpush3.bf16.msra.mxu0 %v402_v8 }
  0x26   : > { %382 = vmatmul.mubr.bf16.vlgmr.msra.gmra.mrb[0].mxu0 %v403_v9 }
  0xf9   : > { %v254_v10 = vpop.f32.mrb[0].mxu0 }
  0xfa   : > { %v383_v11 = vpop.f32.mrb[1].mxu0 }
  0xfb   : > { %v257_v12 = vpop.f32.mrb[2].mxu0 }
  0xfc   : > { %v354_v13 = vpack.c.bf16 %v257_v12, %v254_v10  ;;  %v384_v14 = vpop.f32.mrb[3].mxu0 }
  0xfe   : > { %355 = vst [vmem:[%s145_s6] sm:$0xff] %v354_v13  }
  0xff PF: > { %s12_s9 = sadd.s32 1, %s410_s9  }
 0x100   : > { %p9_p4 = scmp.ge.s32.totalorder %s12_s9, 4  }
 0x102   :  { %11 = sbr.rel (!%p9_p4) target bundleno = 1 (0x1), region = 58 }

// kernel: gcn_encoder_forward.5
= control target key start
LH: loop header
LB: loop body
LE: loop exit
PB: predicated region body
PF: predicated region fallthrough
CT: control target
= control target key end

     0   :  { %s490_s12 = smov 0   ;;  %s492_s13 = smov 0   ;;  %s532_s0 = inlined_call_operand.vmem [shape: bf16[32,32], index: 0, kind: input, shape index: {}]   ;;  %s533_s1 = inlined_call_operand.vmem [shape: bf16[32,128], index: 1, kind: input, shape index: {}]   ;;  %s534_s2 = inlined_call_operand.vmem [shape: f32[1,128], index: 2, kind: input, shape index: {}]   ;;  %s535_s3 = inlined_call_operand.vmem [shape: bf16[32,128], index: 3, kind: output, shape index: {}]  }
   0x1   :  { %s494_s14 = smov 0  }
   0x2 LB: > { %s25_s15 = sadd.s32 1, %s462_s13  ;;  %p383_p0 = scmp.ge.s32.totalorder %s466_s14, 1  ;;  %s466_s14 = sphi %s494_s14, %s13_s14   ;;  %s462_s13 = sphi %s492_s13, %s537_s13   ;;  %s458_s12 = sphi %s490_s12, %s536_s12  }
   0x3   : > { %p27_p1 = scmp.ge.s32.totalorder %s25_s15, 2  ;;  %p155_p2 = scmp.lt.s32.totalorder %s466_s14, 3 }
   0x5   : > { %s539_s15 = smov (%p27_p1, %s25_s15), 0  ;;  %p156_p3 = pnand %p383_p0, %p155_p2 }
   0x6   : > { %v441_v0 = vld [vmem:[%s533_s1] sm:$0xff] (!%p156_p3)   ;;  %v468_v1 = vmov (!%p156_p3), 0.0   ;;  %v442_v2 = vld [vmem:[%s533_s1 + $0x8] sm:$0xff] (!%p156_p3)   ;;  %vm469_vm0 = vmmov (!%p156_p3), 0   ;;  %s384_s20 = sshll.u32 (!%p156_p3), %s458_s12, 1  ;;  %vm234_vm1 = vcmask (!%p156_p3), 261120  }
   0x7   : > { %159 = sbr.rel (%p156_p3) target bundleno = 239 (0xef), region = 32  ;;  %407 = vmatprep.subr.bf16.mxu0 (!%p156_p3), %v468_v1  ;;  %411 = vmatprep.mubr.msk.bf16.mxu0 (!%p156_p3), %vm469_vm0, %v468_v1  ;;  %p183_p4 = scmp.lt.s32.totalorder (!%p156_p3), %s384_s20, 3  ;;  %v392_v4 = vld [vmem:[%s534_s2] ss:$0 sm:$0xff] (!%p156_p3) }
   0x8   : > { %408 = vmatpush3.bf16.msra.mxu0 (!%p156_p3), %v441_v0 }
   0x9   : > { %409 = vmatprep.subr.bf16.mxu0 (!%p156_p3), %v468_v1 }
   0xc   : > { %410 = vmatpush3.bf16.msra.mxu0 (!%p156_p3), %v442_v2 }
   0xe   : > { %s541_s20 = smov (!%p183_p4, %s384_s20), 3 }
   0xf   : > { %s385_s21 = sshll.u32 %s541_s20, 2 }
  0x10   : > { %s189_s24 = scalar_lea.vmem %s532_s0, %s385_s21  ;;  %s195_s29 = scalar_lea.vmem %s535_s3, %s385_s21 }
  0x11   : > { %v443_v3 = vld [vmem:[%s189_s24] sm:$0xff]  }
  0x12   : > { %412 = vmatmul.mubr.msk.bf16.vlgmr.msra.gmra.mrb[0].mxu0 %vm234_vm1, %v443_v3 }
  0xe5   : > { %v272_v5 = vpop.f32.mrb[0].mxu0 }
  0xe6   : > { %v295_v6 = vadd.f32 %v392_v4, %v272_v5  ;;  %v413_v7 = vpop.f32.mrb[1].mxu0 }
  0xe7   : > { %v275_v8 = vpop.f32.mrb[2].mxu0 }
  0xe8   : > { %v296_v9 = vadd.f32 %v392_v4, %v275_v8  ;;  %v414_v10 = vpop.f32.mrb[3].mxu0  ;;  %v297_v11 = vmax.f32 %v295_v6, 0.0 }
  0xea   : > { %v298_v12 = vmax.f32 %v296_v9, 0.0 }
  0xec   : > { %v402_v13 = vpack.c.bf16 %v298_v12, %v297_v11 }
  0xee   : > { %403 = vst [vmem:[%s195_s29] sm:$0xff] %v402_v13  }
  0xef PF: > { %s13_s14 = sadd.s32 1, %s466_s14   ;;  %s536_s12 = smov %s462_s13 }
  0xf0   : > { %p10_p5 = scmp.ge.s32.totalorder %s13_s14, 4   ;;  %s537_s13 = smov %s539_s15 }
  0xf2   :  { %12 = sbr.rel (!%p10_p5) target bundleno = 2 (0x2), region = 71 }

// kernel: gcn_encoder_forward.7
= control target key start
LH: loop header
LB: loop body
LE: loop exit
PB: predicated region body
PF: predicated region fallthrough
CT: control target
= control target key end

     0   :  { %s471_s12 = smov 0   ;;  %s473_s13 = smov 0   ;;  %s513_s0 = inlined_call_operand.vmem [shape: bf16[32,32], index: 0, kind: input, shape index: {}]   ;;  %s514_s1 = inlined_call_operand.vmem [shape: bf16[32,128], index: 1, kind: input, shape index: {}]   ;;  %s515_s2 = inlined_call_operand.vmem [shape: f32[1,128], index: 2, kind: input, shape index: {}]   ;;  %s516_s3 = inlined_call_operand.vmem [shape: f32[32,128], index: 3, kind: output, shape index: {}]  }
   0x1   :  { %s475_s14 = smov 0  }
   0x2 LB: > { %s25_s15 = sadd.s32 1, %s443_s13  ;;  %p373_p0 = scmp.ge.s32.totalorder %s447_s14, 1  ;;  %s447_s14 = sphi %s475_s14, %s13_s14   ;;  %s443_s13 = sphi %s473_s13, %s518_s13   ;;  %s439_s12 = sphi %s471_s12, %s517_s12  }
   0x3   : > { %p27_p1 = scmp.ge.s32.totalorder %s25_s15, 2  ;;  %p155_p2 = scmp.lt.s32.totalorder %s447_s14, 3 }
   0x5   : > { %s520_s15 = smov (%p27_p1, %s25_s15), 0  ;;  %p156_p3 = pnand %p373_p0, %p155_p2 }
   0x6   : > { %v422_v0 = vld [vmem:[%s514_s1] sm:$0xff] (!%p156_p3)   ;;  %v449_v1 = vmov (!%p156_p3), 0.0   ;;  %v423_v2 = vld [vmem:[%s514_s1 + $0x8] sm:$0xff] (!%p156_p3)   ;;  %vm450_vm0 = vmmov (!%p156_p3), 0   ;;  %s374_s20 = sshll.u32 (!%p156_p3), %s439_s12, 1  ;;  %vm234_vm1 = vcmask (!%p156_p3), 261120  }
   0x7   : > { %159 = sbr.rel (%p156_p3) target bundleno = 235 (0xeb), region = 32  ;;  %388 = vmatprep.subr.bf16.mxu0 (!%p156_p3), %v449_v1  ;;  %392 = vmatprep.mubr.msk.bf16.mxu0 (!%p156_p3), %vm450_vm0, %v449_v1  ;;  %p183_p4 = scmp.lt.s32.totalorder (!%p156_p3), %s374_s20, 3  ;;  %v382_v4 = vld [vmem:[%s515_s2] ss:$0 sm:$0xff] (!%p156_p3) }
   0x8   : > { %389 = vmatpush3.bf16.msra.mxu0 (!%p156_p3), %v422_v0 }
   0x9   : > { %390 = vmatprep.subr.bf16.mxu0 (!%p156_p3), %v449_v1 }
   0xc   : > { %391 = vmatpush3.bf16.msra.mxu0 (!%p156_p3), %v423_v2 }
   0xe   : > { %s522_s20 = smov (!%p183_p4, %s374_s20), 3 }
   0xf   : > { %s375_s21 = sshll.u32 %s522_s20, 2  ;;  %s377_s25 = sshll.u32 %s522_s20, 3 }
  0x10   : > { %s189_s24 = scalar_lea.vmem %s513_s0, %s375_s21  ;;  %s195_s30 = scalar_lea.vmem %s516_s3, %s377_s25 }
  0x11   : > { %v424_v3 = vld [vmem:[%s189_s24] sm:$0xff]  }
  0x12   : > { %393 = vmatmul.mubr.msk.bf16.vlgmr.msra.gmra.mrb[0].mxu0 %vm234_vm1, %v424_v3 }
  0xe5   : > { %v272_v5 = vpop.f32.mrb[0].mxu0 }
  0xe6   : > { %v295_v6 = vadd.f32 %v382_v4, %v272_v5  ;;  %v394_v7 = vpop.f32.mrb[1].mxu0 }
  0xe7   : > { %v275_v8 = vpop.f32.mrb[2].mxu0 }
  0xe8   : > { %297 = vst [vmem:[%s195_s30] sm:$0xff] %v295_v6  ;;  %v296_v9 = vadd.f32 %v382_v4, %v275_v8  ;;  %v395_v10 = vpop.f32.mrb[3].mxu0 }
  0xea   : > { %298 = vst [vmem:[%s195_s30 + $0x8] sm:$0xff] %v296_v9 }
  0xeb PF: > { %s13_s14 = sadd.s32 1, %s447_s14   ;;  %s517_s12 = smov %s443_s13 }
  0xec   : > { %p10_p5 = scmp.ge.s32.totalorder %s13_s14, 4   ;;  %s518_s13 = smov %s520_s15 }
  0xee   :  { %12 = sbr.rel (!%p10_p5) target bundleno = 2 (0x2), region = 71 }

</bundles_post_ra>
